<compile_context>
chip_gen: v6e
topology: v6e:2x2x1
jax: 0.10.0
libtpu: 0.0.40
codegen_flags: <defaults>
</compile_context>

<pallas_src>
import functools

import jax
import jax.numpy as jnp
from jax import lax
from jax.experimental import pallas as pl
from jax.experimental.pallas import tpu as pltpu

_SQRT_HALF = 0.7071067811865476  # 1/sqrt(2)


def _gelu_exact(x):
    # Matches torch.nn.GELU() default (erf-based, not tanh approx).
    return 0.5 * x * (1.0 + lax.erf(x * _SQRT_HALF))


def ffn_kernel(x_ref, w1_ref, b1_ref, w2_ref, b2_ref, o_ref, acc_ref, *, act_dtype):
    h_idx = pl.program_id(1)

    @pl.when(h_idx == 0)
    def _():
        acc_ref[...] = jnp.zeros_like(acc_ref)

    # fc1 partial: (tm, D) @ (D, th) -> (tm, th), f32 accumulation on the MXU.
    h = jnp.dot(x_ref[...], w1_ref[...], preferred_element_type=jnp.float32)
    # Bias + exact GELU.  act_dtype is bf16 when the input is bf16 (packed
    # VPU/EUP on v6e/v7x halves the erf-polynomial VALU work), f32 otherwise.
    h = h.astype(act_dtype) + b1_ref[...].astype(act_dtype)
    h = _gelu_exact(h)
    # Cast back to the input dtype so bf16 inputs run fc2 at full MXU rate
    # (f32 accumulation is kept via preferred_element_type).
    h = h.astype(x_ref.dtype)

    # fc2 partial over this H tile: (tm, th) @ (th, D) -> (tm, D).
    acc_ref[...] += jnp.dot(h, w2_ref[...], preferred_element_type=jnp.float32)

    @pl.when(h_idx == pl.num_programs(1) - 1)
    def _():
        o_ref[...] = (acc_ref[...] + b2_ref[...].astype(jnp.float32)).astype(o_ref.dtype)


def _round_up(x, m):
    return ((x + m - 1) // m) * m


def _cdiv(a, b):
    return -(-a // b)


def _vmem_capacity_bytes():
    try:
        info = pltpu.get_tpu_info()
        cap = int(getattr(info, "vmem_capacity_bytes", 0) or 0)
        if cap > 0:
            return cap
    except Exception:
        pass
    # Conservative fallback: v7x has 64 MiB per TensorCore (v5e/v6e have 128 MiB).
    return 64 << 20


def _vmem_estimate(tm, th, D, itemsize):
    # Double-buffered operands + f32 accumulator + slack for compiler scratch.
    x_b = 2 * tm * D * itemsize
    out_b = 2 * tm * D * itemsize
    w1_b = 2 * D * th * itemsize
    w2_b = 2 * th * D * itemsize
    b1_b = 2 * 8 * th * itemsize
    b2_b = 2 * 8 * D * itemsize
    acc_b = tm * D * 4
    return x_b + out_b + w1_b + w2_b + b1_b + b2_b + acc_b + (1 << 20)


def _divisor_tile(total, desired, gran):
    """Largest multiple of `gran` <= desired dividing `total`; falls back to total."""
    if total <= desired:
        return total
    t = max((desired // gran) * gran, gran)
    while t > gran and total % t != 0:
        t -= gran
    return t if total % t == 0 else total


def _plan_tiles(M, D, H, itemsize, vmem_cap, tm_override=None, th_override=None):
    budget = int(0.80 * vmem_cap)
    small_vmem = vmem_cap <= (64 << 20)      # v7x-class VMEM budget
    tm_desired = 512 if small_vmem else 1024  # amortize weight streaming (HBM-bound fix)
    th_desired = 256 if small_vmem else 512
    gran = 256                                # full 256-wide MXU passes on v6e/v7x

    def row_plan(tm_des):
        # Minimal-padding row tiling.
        num_m = max(1, _cdiv(M, tm_des))
        tm = _round_up(_cdiv(M, num_m), 8)
        return tm, num_m * tm

    if tm_override is not None or th_override is not None:
        # Explicit tiles (testing / tuning knob).
        tm_des = tm_override if tm_override is not None else tm_desired
        tm, Mp = row_plan(max(8, tm_des))
        if th_override is not None:
            th = th_override
            Hp = _round_up(H, th)
        else:
            if _vmem_estimate(tm, H, D, itemsize) <= budget:
                th, Hp = H, H
            else:
                Hp = _round_up(H, gran)
                th = _divisor_tile(Hp, th_desired, gran)
        return tm, Mp, th, Hp, _vmem_estimate(tm, th, D, itemsize)

    tm_cands = []
    t = tm_desired
    while t >= 256:
        tm_cands.append(t)
        t //= 2
    tm_cands.append(128)

    best = None
    for tm_des in tm_cands:
        tm, Mp = row_plan(tm_des)
        # Resident-weights fast path: both weight matrices stay in VMEM for the
        # whole grid (single H step) -> weights stream from HBM exactly once.
        est = _vmem_estimate(tm, H, D, itemsize)
        if est <= budget:
            return tm, Mp, H, H, est
        # Tiled-H path (pad H to a 256-multiple so the MXU stays fully occupied
        # and VMEM never sees an untiled full-H weight block).
        Hp = _round_up(H, gran)
        th = _divisor_tile(Hp, th_desired, gran)
        while _vmem_estimate(tm, th, D, itemsize) > budget and th > gran:
            nt = th - gran
            while nt > gran and Hp % nt != 0:
                nt -= gran
            th = nt
        est = _vmem_estimate(tm, th, D, itemsize)
        if est <= budget:
            return tm, Mp, th, Hp, est
        best = (tm, Mp, th, Hp, est)
    return best


def ffn_forward(x, w1, b1, w2, b2, *, tm=None, th=None):
    """x: (batch, seq, d_model); w: (in, out) [transposed vs torch]; b: (out,)."""
    B, S, D = x.shape
    H = w1.shape[1]
    M = B * S
    itemsize = jnp.dtype(x.dtype).itemsize

    vmem_cap = _vmem_capacity_bytes()
    tm, Mp, th, Hp, vmem_est = _plan_tiles(
        M, D, H, itemsize, vmem_cap, tm_override=tm, th_override=th)
    grid_m, grid_h = Mp // tm, Hp // th

    x2d = x.reshape(M, D)
    if Mp != M:
        x2d = jnp.pad(x2d, ((0, Mp - M), (0, 0)))

    # Zero-pad the hidden dim if needed: GELU(0) = 0 and the padded w2 rows are
    # zero, so padded hidden units contribute nothing to the output.
    if Hp != H:
        w1 = jnp.pad(w1, ((0, 0), (0, Hp - H)))
        b1 = jnp.pad(b1, ((0, Hp - H),))
        w2 = jnp.pad(w2, ((0, Hp - H), (0, 0)))

    b1_2d = b1.reshape(1, Hp)
    b2_2d = b2.reshape(1, D)

    # Serpentine H ordering across M tiles: the first weight tile of row i+1
    # equals the last tile of row i, so the pipeline skips that DMA.
    def _h_block(i, h):
        if grid_h <= 1:
            return 0
        return jnp.where(i % 2 == 0, h, grid_h - 1 - h)

    # bf16 inputs keep bias+GELU in bf16 (packed VPU/EUP); f32 stays exact.
    act_dtype = jnp.float32 if jnp.dtype(x.dtype) == jnp.float32 else x.dtype

    # VMEM limit: enough for our tiles, clamped below the physical per-core VMEM
    # (so it is valid on v7x's 64 MiB as well as v5e/v6e's 128 MiB).
    vmem_limit = int(min(int(0.92 * vmem_cap),
                         max(32 << 20, vmem_est + vmem_est // 4 + (4 << 20))))

    # Real HBM traffic: weights stream once when resident, once per M tile otherwise.
    weight_bytes = 2 * D * Hp * itemsize
    weight_stream = weight_bytes * (1 if grid_h == 1 else grid_m)
    cost = pl.CostEstimate(
        flops=4 * Mp * D * Hp,                 # two matmuls: 2*M*D*H each
        transcendentals=Mp * Hp,               # erf per fc1 activation
        bytes_accessed=int(2 * Mp * D * itemsize + weight_stream
                           + (Hp + D) * itemsize),
    )

    kernel = functools.partial(ffn_kernel, act_dtype=act_dtype)

    out2d = pl.pallas_call(
        kernel,
        out_shape=jax.ShapeDtypeStruct((Mp, D), x.dtype),
        grid_spec=pltpu.PrefetchScalarGridSpec(
            num_scalar_prefetch=0,
            grid=(grid_m, grid_h),
            in_specs=[
                pl.BlockSpec((tm, D), lambda i, h: (i, 0)),               # x rows
                pl.BlockSpec((D, th), lambda i, h: (0, _h_block(i, h))),  # w1 tile
                pl.BlockSpec((1, th), lambda i, h: (0, _h_block(i, h))),  # b1 tile
                pl.BlockSpec((th, D), lambda i, h: (_h_block(i, h), 0)),  # w2 tile
                pl.BlockSpec((1, D), lambda i, h: (0, 0)),                # b2 (resident)
            ],
            out_specs=pl.BlockSpec((tm, D), lambda i, h: (i, 0)),
            scratch_shapes=[pltpu.VMEM((tm, D), jnp.float32)],
        ),
        compiler_params=pltpu.CompilerParams(
            dimension_semantics=("parallel", "arbitrary"),
            vmem_limit_bytes=vmem_limit,
        ),
        cost_estimate=cost,
    )(x2d, w1, b1_2d, w2, b2_2d)

    if Mp != M:
        out2d = out2d[:M]
    return out2d.reshape(B, S, D)


def _ref_ffn(x, w1, b1, w2, b2):
    h = jnp.einsum("bsd,dh->bsh", x, w1) + b1
    h = _gelu_exact(h)
    return jnp.einsum("bsh,hd->bsd", h, w2) + b2


def _make_params(key, d_model, hidden, dtype=jnp.float32):
    k1, kb1, k2, kb2 = jax.random.split(key, 4)
    lim1 = 1.0 / (d_model ** 0.5)
    lim2 = 1.0 / (hidden ** 0.5)
    w1 = jax.random.uniform(k1, (d_model, hidden), dtype, -lim1, lim1)
    b1 = jax.random.uniform(kb1, (hidden,), dtype, -lim1, lim1)
    w2 = jax.random.uniform(k2, (hidden, d_model), dtype, -lim2, lim2)
    b2 = jax.random.uniform(kb2, (d_model,), dtype, -lim2, lim2)
    return w1, b1, w2, b2


if __name__ == "__main__":
    key = jax.random.PRNGKey(0)

    # --- Small-shape check (module-implied sizes): resident-weights path -----
    batch, seq, d_model, exp_factor = 2, 8, 32, 4
    hidden = d_model * exp_factor
    kx, kp = jax.random.split(key)
    x = jax.random.normal(kx, (batch, seq, d_model), dtype=jnp.float32)
    w1, b1, w2, b2 = _make_params(kp, d_model, hidden)

    out = ffn_forward(x, w1, b1, w2, b2)
    jax.block_until_ready(out)
    ref = _ref_ffn(x, w1, b1, w2, b2)
    assert out.shape == (batch, seq, d_model)
    assert jnp.allclose(out, ref, atol=1e-5, rtol=1e-5)

    # --- Ragged-M path (minimal padding: M=300 -> Mp=304, not 512) -----------
    batch2, seq2, d_model2, exp2 = 2, 150, 128, 8
    hidden2 = d_model2 * exp2
    kx2, kp2 = jax.random.split(jax.random.PRNGKey(1))
    x2 = jax.random.normal(kx2, (batch2, seq2, d_model2), dtype=jnp.float32)
    w1b, b1b, w2b, b2b = _make_params(kp2, d_model2, hidden2)

    out2 = ffn_forward(x2, w1b, b1b, w2b, b2b)
    jax.block_until_ready(out2)
    ref2 = _ref_ffn(x2, w1b, b1b, w2b, b2b)
    assert out2.shape == (batch2, seq2, d_model2)
    assert bool(jnp.all(jnp.isfinite(out2)))
    assert jnp.allclose(out2, ref2, atol=1e-2, rtol=1e-2)

    # --- Forced tiled-H path (multi-step reduction + serpentine weight order) -
    out3 = ffn_forward(x2, w1b, b1b, w2b, b2b, tm=128, th=256)
    jax.block_until_ready(out3)
    assert jnp.allclose(out3, ref2, atol=1e-2, rtol=1e-2)

    print("KERNEL_OK")
</pallas_src>

<mosaic_0001>
module attributes {stable_mosaic.version = 11 : i64} {
  func.func @ffn_kernel(%arg0: i32, %arg1: i32, %arg2: memref<16x32xf32, #tpu.memory_space<vmem>>, %arg3: memref<32x128xf32, #tpu.memory_space<vmem>>, %arg4: memref<1x128xf32, #tpu.memory_space<vmem>>, %arg5: memref<128x32xf32, #tpu.memory_space<vmem>>, %arg6: memref<1x32xf32, #tpu.memory_space<vmem>>, %arg7: memref<16x32xf32, #tpu.memory_space<vmem>>, %arg8: memref<16x32xf32, #tpu.memory_space<vmem>>) attributes {dimension_semantics = [#tpu.dimension_semantics<parallel>, #tpu.dimension_semantics<arbitrary>], iteration_bounds = array<i64: 1, 1>, scalar_prefetch = 0 : i64, scratch_operands = 1 : i64, tpu.core_type = #tpu.core_type<tc>, window_params = [{transform_indices = @transform_0, window_bounds = array<i64: 16, 32>}, {pipeline_mode = #tpu.pipeline_mode<synchronous>, transform_indices = @transform_1, window_bounds = array<i64: 32, 128>}, {pipeline_mode = #tpu.pipeline_mode<synchronous>, transform_indices = @transform_2, window_bounds = array<i64: 1, 128>}, {pipeline_mode = #tpu.pipeline_mode<synchronous>, transform_indices = @transform_3, window_bounds = array<i64: 128, 32>}, {pipeline_mode = #tpu.pipeline_mode<synchronous>, transform_indices = @transform_4, window_bounds = array<i64: 1, 32>}, {transform_indices = @transform_5, window_bounds = array<i64: 16, 32>}]} {
    %c0_i32 = arith.constant 0 : i32
    %0 = arith.cmpi eq, %arg1, %c0_i32 : i32
    %1 = arith.extui %0 : i1 to i32
    %c0_i32_0 = arith.constant 0 : i32
    %2 = arith.cmpi ne, %1, %c0_i32_0 : i32
    scf.if %2 {
      %cst_18 = arith.constant 0.000000e+00 : f32
      %25 = vector.broadcast %cst_18 : f32 to vector<16x32xf32>
      %c0_19 = arith.constant 0 : index
      %c0_20 = arith.constant 0 : index
      %26 = vector.load %arg8[%c0_19, %c0_20] : memref<16x32xf32, #tpu.memory_space<vmem>>, vector<16x32xf32>
      tpu.vector_store %arg8[%c0_19, %c0_20], %25 {strides = array<i32>} : memref<16x32xf32, #tpu.memory_space<vmem>>, vector<16x32xf32>,
    } else {
    }
    %c0 = arith.constant 0 : index
    %c0_1 = arith.constant 0 : index
    %3 = vector.load %arg2[%c0, %c0_1] : memref<16x32xf32, #tpu.memory_space<vmem>>, vector<16x32xf32>
    %c0_2 = arith.constant 0 : index
    %c0_3 = arith.constant 0 : index
    %4 = vector.load %arg3[%c0_2, %c0_3] : memref<32x128xf32, #tpu.memory_space<vmem>>, vector<32x128xf32>
    %cst = arith.constant dense<0.000000e+00> : vector<16x128xf32>
    %5 = tpu.matmul %3, %4, %cst {dimension_numbers = #tpu.dot_dimension_numbers<[1], [0], [0], [1], [0, 0, 1, 1], [], []>} : vector<16x32xf32>, vector<32x128xf32>, vector<16x128xf32> -> vector<16x128xf32>
    %c0_4 = arith.constant 0 : index
    %c0_5 = arith.constant 0 : index
    %6 = vector.load %arg4[%c0_4, %c0_5] : memref<1x128xf32, #tpu.memory_space<vmem>>, vector<1x128xf32>
    %7 = vector.broadcast %6 : vector<1x128xf32> to vector<16x128xf32>
    %8 = arith.addf %5, %7 : vector<16x128xf32>
    %cst_6 = arith.constant 5.000000e-01 : f32
    %9 = vector.broadcast %cst_6 : f32 to vector<16x128xf32>
    %10 = arith.mulf %9, %8 : vector<16x128xf32>
    %cst_7 = arith.constant 0.707106769 : f32
    %11 = vector.broadcast %cst_7 : f32 to vector<16x128xf32>
    %12 = arith.mulf %8, %11 : vector<16x128xf32>
    %13 = math.erf %12 : vector<16x128xf32>
    %cst_8 = arith.constant 1.000000e+00 : f32
    %14 = vector.broadcast %cst_8 : f32 to vector<16x128xf32>
    %15 = arith.addf %14, %13 : vector<16x128xf32>
    %16 = arith.mulf %10, %15 : vector<16x128xf32>
    %c0_9 = arith.constant 0 : index
    %c0_10 = arith.constant 0 : index
    %17 = vector.load %arg8[%c0_9, %c0_10] : memref<16x32xf32, #tpu.memory_space<vmem>>, vector<16x32xf32>
    %c0_11 = arith.constant 0 : index
    %c0_12 = arith.constant 0 : index
    %18 = vector.load %arg5[%c0_11, %c0_12] : memref<128x32xf32, #tpu.memory_space<vmem>>, vector<128x32xf32>
    %cst_13 = arith.constant dense<0.000000e+00> : vector<16x32xf32>
    %19 = tpu.matmul %16, %18, %cst_13 {dimension_numbers = #tpu.dot_dimension_numbers<[1], [0], [0], [1], [0, 0, 1, 1], [], []>} : vector<16x128xf32>, vector<128x32xf32>, vector<16x32xf32> -> vector<16x32xf32>
    %20 = arith.addf %17, %19 : vector<16x32xf32>
    %c0_14 = arith.constant 0 : index
    %c0_15 = arith.constant 0 : index
    %21 = vector.load %arg8[%c0_14, %c0_15] : memref<16x32xf32, #tpu.memory_space<vmem>>, vector<16x32xf32>
    tpu.vector_store %arg8[%c0_14, %c0_15], %20 {strides = array<i32>} : memref<16x32xf32, #tpu.memory_space<vmem>>, vector<16x32xf32>,
    %c0_i32_16 = arith.constant 0 : i32
    %22 = arith.cmpi eq, %arg1, %c0_i32_16 : i32
    %23 = arith.extui %22 : i1 to i32
    %c0_i32_17 = arith.constant 0 : i32
    %24 = arith.cmpi ne, %23, %c0_i32_17 : i32
    scf.if %24 {
      %c0_18 = arith.constant 0 : index
      %c0_19 = arith.constant 0 : index
      %25 = vector.load %arg8[%c0_18, %c0_19] : memref<16x32xf32, #tpu.memory_space<vmem>>, vector<16x32xf32>
      %c0_20 = arith.constant 0 : index
      %c0_21 = arith.constant 0 : index
      %26 = vector.load %arg6[%c0_20, %c0_21] : memref<1x32xf32, #tpu.memory_space<vmem>>, vector<1x32xf32>
      %27 = vector.broadcast %26 : vector<1x32xf32> to vector<16x32xf32>
      %28 = arith.addf %25, %27 : vector<16x32xf32>
      %c0_22 = arith.constant 0 : index
      %c0_23 = arith.constant 0 : index
      %29 = vector.load %arg7[%c0_22, %c0_23] : memref<16x32xf32, #tpu.memory_space<vmem>>, vector<16x32xf32>
      tpu.vector_store %arg7[%c0_22, %c0_23], %28 {strides = array<i32>} : memref<16x32xf32, #tpu.memory_space<vmem>>, vector<16x32xf32>,
    } else {
    }
    return
  }
  func.func @transform_0(%arg0: i32, %arg1: i32) -> (i32, i32) {
    %c0_i32 = arith.constant 0 : i32
    %c0_i32_0 = arith.constant 0 : i32
    return %arg0, %c0_i32 : i32, i32
  }
  func.func @transform_1(%arg0: i32, %arg1: i32) -> (i32, i32) {
    %c0_i32 = arith.constant 0 : i32
    %c0_i32_0 = arith.constant 0 : i32
    %c0_i32_1 = arith.constant 0 : i32
    return %c0_i32, %c0_i32_0 : i32, i32
  }
  func.func @transform_2(%arg0: i32, %arg1: i32) -> (i32, i32) {
    %c0_i32 = arith.constant 0 : i32
    %c0_i32_0 = arith.constant 0 : i32
    %c0_i32_1 = arith.constant 0 : i32
    return %c0_i32, %c0_i32_0 : i32, i32
  }
  func.func @transform_3(%arg0: i32, %arg1: i32) -> (i32, i32) {
    %c0_i32 = arith.constant 0 : i32
    %c0_i32_0 = arith.constant 0 : i32
    %c0_i32_1 = arith.constant 0 : i32
    return %c0_i32, %c0_i32_0 : i32, i32
  }
  func.func @transform_4(%arg0: i32, %arg1: i32) -> (i32, i32) {
    %c0_i32 = arith.constant 0 : i32
    %c0_i32_0 = arith.constant 0 : i32
    %c0_i32_1 = arith.constant 0 : i32
    return %c0_i32, %c0_i32_0 : i32, i32
  }
  func.func @transform_5(%arg0: i32, %arg1: i32) -> (i32, i32) {
    %c0_i32 = arith.constant 0 : i32
    %c0_i32_0 = arith.constant 0 : i32
    return %arg0, %c0_i32 : i32, i32
  }
}

</mosaic_0001>

<bundles_post_ra>
// kernel: tpu_custom_call.1
= control target key start
LH: loop header
LB: loop body
LE: loop exit
PB: predicated region body
PF: predicated region fallthrough
CT: control target
= control target key end

     0   :  { %vm25_vm0 = vcmask 261120   ;;  %s483_s0 = inlined_call_operand.vmem [shape: f32[16,32], index: 0, kind: input, shape index: {}]   ;;  %s484_s1 = inlined_call_operand.vmem [shape: f32[32,128], index: 1, kind: input, shape index: {}]   ;;  %s485_s2 = inlined_call_operand.vmem [shape: f32[1,128], index: 2, kind: input, shape index: {}]   ;;  %s486_s3 = inlined_call_operand.vmem [shape: f32[128,32], index: 3, kind: input, shape index: {}]   ;;  %s487_s4 = inlined_call_operand.vmem [shape: f32[1,32], index: 4, kind: input, shape index: {}]   ;;  %s488_s5 = inlined_call_operand.hbm [shape: f32[16,32], index: 5, kind: output, shape index: {}]  }
   0x1   :  { %v33_v0 = vld [vmem:[%s484_s1 + $0x18] sm:$0xff]  ;;  %v32_v1 = vld [vmem:[%s484_s1 + $0x10] sm:$0xff]  ;;  %v28_v2 = vld [vmem:[%s483_s0] sm:$0xff] }
   0x2   :  { %290 = vmatprep.subr.mxu0 %v33_v0  ;;  %v31_v3 = vld [vmem:[%s484_s1 + $0x8] sm:$0xff]  ;;  %298 = vmatprep.mubr.msk.f32.mxu0 %vm25_vm0, %v28_v2  ;;  %v150_v4 = vld [vmem:[%s486_s3 + $0x78] sm:$0xff]  ;;  %v149_v5 = vld [vmem:[%s486_s3 + $0x70] sm:$0xff] }
   0x3   :  { %291 = vmatpush3.msra.mxu0 %v33_v0  ;;  %301 = vmatprep.subr.mxu1 %v150_v4 }
   0x4   :  { %292 = vmatprep.subr.mxu0 %v32_v1 }
   0x5   :  { %10 = vsyncpa [#allocation4], 0  ;;  %293 = vmatpush3.msra.mxu0 %v32_v1  ;;  %v30_v6 = vld [vmem:[%s484_s1] sm:$0xff]  ;;  %302 = vmatpush3.msra.mxu1 %v150_v4  ;;  %v148_v7 = vld [vmem:[%s486_s3 + $0x68] sm:$0xff]  ;;  %v366_v22 = vmov 0.0   ;;  %s367_s11 = smov [#allocation3]  }
   0x6   :  { %294 = vmatprep.subr.mxu0 %v31_v3  ;;  %303 = vmatprep.subr.mxu1 %v149_v5  ;;  %v29_v8 = vld [vmem:[%s483_s0 + $0x8] sm:$0xff]  ;;  %v147_v9 = vld [vmem:[%s486_s3 + $0x60] sm:$0xff]  ;;  %v146_v10 = vld [vmem:[%s486_s3 + $0x58] sm:$0xff]  ;;  %27 = vst.msk [vmem:[#allocation2 + $0x8] sm:$0xff] %vm25_vm0, %v366_v22  ;;  %s251_s12 = sshll.u32 %s367_s11, 4  ;;  %s252_s12 = int_to_ptr.vmem [resolvable:$true] %s251_s12 }
   0x7   :  { %295 = vmatpush3.msra.mxu0 %v31_v3  ;;  %304 = vmatpush3.msra.mxu1 %v149_v5  ;;  %v145_v11 = vld [vmem:[%s486_s3 + $0x50] sm:$0xff]  ;;  %v144_v12 = vld [vmem:[%s486_s3 + $0x48] sm:$0xff]  ;;  %v143_v13 = vld [vmem:[%s486_s3 + $0x40] sm:$0xff]  ;;  %26 = vst.msk [vmem:[#allocation2] sm:$0xff] %vm25_vm0, %v366_v22  ;;  %s344_s13 = scalar_lea.vmem %s252_s12, 256  ;;  %p349_p1 = scmp.lt.s32.totalorder %s252_s12, %s252_s12 }
   0x8   :  { %296 = vmatprep.subr.mxu0 %v30_v6  ;;  %305 = vmatprep.subr.mxu1 %v148_v7  ;;  %v142_v14 = vld [vmem:[%s486_s3 + $0x38] sm:$0xff]  ;;  %v141_v15 = vld [vmem:[%s486_s3 + $0x30] sm:$0xff]  ;;  %v140_v16 = vld [vmem:[%s486_s3 + $0x28] sm:$0xff]  ;;  %p345_p0 = scmp.ne.s32.totalorder %s252_s12, %s344_s13  ;;  %p350_p2 = scmp.lt.s32.totalorder %s344_s13, %s344_s13 }
   0x9   :  { %297 = vmatpush3.msra.mxu0 %v30_v6  ;;  %306 = vmatpush3.msra.mxu1 %v148_v7  ;;  %v139_v17 = vld [vmem:[%s486_s3 + $0x20] sm:$0xff]  ;;  %v138_v18 = vld [vmem:[%s486_s3 + $0x18] sm:$0xff]  ;;  %v137_v19 = vld [vmem:[%s486_s3 + $0x10] sm:$0xff] }
   0xa   :  { %299 = vmatmul.mubr.msk.f32.vlgmr.msra.gmra.mxu0 %vm25_vm0, %v29_v8  ;;  %307 = vmatprep.subr.mxu1 %v147_v9  ;;  %v136_v20 = vld [vmem:[%s486_s3 + $0x8] sm:$0xff]  ;;  %v135_v21 = vld [vmem:[%s486_s3] sm:$0xff]  ;;  %p351_p3 = por %p350_p2, %p349_p1 }
   0xb   :  { %308 = vmatpush3.msra.mxu1 %v147_v9  ;;  %v262_v23 = vld [vmem:[%s485_s2] ss:$0 sm:$0xff] }
   0xc   :  { %309 = vmatprep.subr.mxu1 %v146_v10  ;;  %v265_v44 = vld [vmem:[%s487_s4] ss:$0 sm:$0xff]  ;;  %p352_p4 = pnand %p351_p3, %p345_p0 }
   0xd   :  { %310 = vmatpush3.msra.mxu1 %v146_v10  ;;  %v134_v38 = vld [vmem:[#allocation2 + $0x8] sm:$0xff] }
   0xe   :  { %311 = vmatprep.subr.mxu1 %v145_v11  ;;  %v133_v40 = vld [vmem:[#allocation2] sm:$0xff] }
   0xf   :  { %312 = vmatpush3.msra.mxu1 %v145_v11 }
  0x10   :  { %313 = vmatprep.subr.mxu1 %v144_v12 }
  0x11   :  { %314 = vmatpush3.msra.mxu1 %v144_v12 }
  0x12   :  { %315 = vmatprep.subr.mxu1 %v143_v13 }
  0x13   :  { %316 = vmatpush3.msra.mxu1 %v143_v13 }
  0x14   :  { %317 = vmatprep.subr.mxu1 %v142_v14 }
  0x15   :  { %318 = vmatpush3.msra.mxu1 %v142_v14 }
  0x16   :  { %319 = vmatprep.subr.mxu1 %v141_v15 }
  0x17   :  { %320 = vmatpush3.msra.mxu1 %v141_v15 }
  0x18   :  { %321 = vmatprep.subr.mxu1 %v140_v16 }
  0x19   :  { %322 = vmatpush3.msra.mxu1 %v140_v16 }
  0x1a   :  { %323 = vmatprep.subr.mxu1 %v139_v17 }
  0x1b   :  { %324 = vmatpush3.msra.mxu1 %v139_v17 }
  0x1c   :  { %325 = vmatprep.subr.mxu1 %v138_v18 }
  0x1d   :  { %326 = vmatpush3.msra.mxu1 %v138_v18 }
  0x1e   :  { %327 = vmatprep.subr.mxu1 %v137_v19 }
  0x1f   :  { %328 = vmatpush3.msra.mxu1 %v137_v19 }
  0x20   :  { %329 = vmatprep.subr.mxu1 %v136_v20 }
  0x21   :  { %330 = vmatpush3.msra.mxu1 %v136_v20 }
  0x22   :  { %331 = vmatprep.subr.mxu1 %v135_v21 }
  0x23   :  { %332 = vmatpush3.msra.mxu1 %v135_v21 }
  0xca   :  { %v300_v24 = vpop.f32.mrf.mxu0 }
  0xcb   :  { %v120_v25 = vadd.f32 %v300_v24, %v262_v23 }
  0xcc   :  { %v114_v26 = vpop.f32.mrf.mxu0 }
  0xcd   :  { %v126_v27 = vmul.f32 0.70710677, %v120_v25  ;;  %v115_v28 = vadd.f32 %v262_v23, %v114_v26  ;;  %v124_v35 = vmul.f32 0.5, %v120_v25 }
  0xcf   :  { %340 = verf.f32 %v126_v27  ;;  %v125_v29 = vmul.f32 0.70710677, %v115_v28  ;;  %v123_v33 = vmul.f32 0.5, %v115_v28 }
  0xd1   :  { %342 = verf.f32 %v125_v29 }
  0xdc   :  { %v341_v30 = vpop.eup %340 }
  0xdd   :  { %v130_v32 = vadd.f32 1.0, %v341_v30 }
  0xde   :  { %v343_v31 = vpop.eup %342 }
  0xdf   :  { %v129_v34 = vadd.f32 1.0, %v343_v31  ;;  %v132_v37 = vmul.f32 %v130_v32, %v124_v35 }
  0xe1   :  { %v131_v36 = vmul.f32 %v129_v34, %v123_v33 }
  0xe3   :  { %333 = vmatprep.mubr.f32.mxu1 %v131_v36 }
  0xe4   :  { %334 = vmatmul.mubr.f32.vlgmr.msra.gmra.mxu1 %v132_v37 }
 0x1a4   :  { %v335_v39 = vpop.f32.mrf.mxu1 }
 0x1a5   :  { %v227_v41 = vadd.f32 %v335_v39, %v134_v38 }
 0x1a6   :  { %v217_v42 = vpop.f32.mrf.mxu1 }
 0x1a7   :  { %229 = vst.msk [vmem:[#allocation2 + $0x8] sm:$0xff] %vm25_vm0, %v227_v41  ;;  %v226_v43 = vadd.f32 %v217_v42, %v133_v40 }
 0x1a9   :  { %228 = vst.msk [vmem:[#allocation2] sm:$0xff] %vm25_vm0, %v226_v43 }
 0x1ae   :  { %v234_v45 = vld [vmem:[#allocation2 + $0x8] sm:$0xff] }
 0x1af   :  { %v243_v46 = vadd.f32 %v265_v44, %v234_v45 }
 0x1b0   :  { %v233_v47 = vld [vmem:[#allocation2] sm:$0xff] }
 0x1b1   :  { %v242_v48 = vadd.f32 %v265_v44, %v233_v47  ;;  %245 = vst.msk [vmem:[#allocation3 + $0x8] sm:$0xff] %vm25_vm0, %v243_v46 }
 0x1b3   :  { %244 = vst.msk [vmem:[#allocation3] sm:$0xff] %vm25_vm0, %v242_v48 }
 0x1b4   :  { %355 = shalt.err (!%p352_p4)
}
 0x1b5   :  { %s368_s0 = smov 128   ;;  %s369_s4 = smov 8  }
 0x1b6   :  { %257 = dma.vmem_to_hbm [thread:$0]  %s252_s12, 256, %s488_s5, [#allocation4], %s368_s0, %s368_s0, %s369_s4  }
 0x1b7   :  { %364 = dma.done.wait [#allocation4], 256  }
 0x1b8   :  { %365 = vsyncadd [#allocation4], 4294967040 }
 0x1b9   :  { %261 = vsyncpa [#allocation4], 1 }

</bundles_post_ra>
